<compile_context>
chip_gen: v5e
topology: v5e:2x2
jax: 0.10.0
libtpu: 0.0.40
codegen_flags: <defaults>
</compile_context>

<pallas_src>
import jax
import jax.numpy as jnp
from jax.experimental import pallas as pl
from jax.experimental.pallas import tpu as pltpu


def _text_attention_kernel(enc_ref, hid_ref, wv_ref, wh_ref, wu_ref, b_ref,
                           out_ref):
    # Per grid step (TB = batch tile):
    #   enc_ref: (TB, S, 2H)   hid_ref: (TB, 2H)
    #   wv_ref : (2H, H)       wh_ref : (2H, H)
    #   wu_ref : (1, H)  f32   b_ref  : (1, H)  f32  (= b_v + b_h folded)
    #   out_ref: (TB, 2H) f32
    tb, s, two_h = enc_ref.shape
    h = wv_ref.shape[1]

    enc = enc_ref[...]                    # (TB, S, 2H)
    hid = hid_ref[...]                    # (TB, 2H)

    # o_v for all TB*S rows in a single MXU matmul (f32 accumulation).
    enc2 = enc.reshape(tb * s, two_h)
    o_v = jnp.dot(enc2, wv_ref[...], preferred_element_type=jnp.float32)
    o_v = o_v.reshape(tb, s, h)           # (TB, S, H) f32

    # o_h batched over the whole tile; fold the bias here (a (TB,H) add)
    # instead of inside the (TB,S,H) broadcast -> one fewer full-size VPU add.
    o_h = jnp.dot(hid, wh_ref[...], preferred_element_type=jnp.float32)  # (TB, H)
    o_hb = o_h + b_ref[...]                                              # (TB, H)

    x = o_v + o_hb[:, None, :]                                           # (TB, S, H)
    if enc_ref.dtype == jnp.bfloat16:
        # bf16 EUP path (v6e/v7x): 2x transcendental throughput; scores are
        # promoted back to f32 by the f32 W_u row below.
        f = jnp.tanh(x.astype(jnp.bfloat16))
    else:
        f = jnp.tanh(x)

    # Attention logits: VPU multiply + lane (H) reduction instead of an N=1
    # matmul.  Result is lane-dense over S, f32.
    scores = jnp.sum(f * wu_ref[...], axis=-1)                           # (TB, S)

    # Softmax over the sequence axis (PyTorch dim=1), all f32.
    m = jnp.max(scores, axis=-1, keepdims=True)
    e = jnp.exp(scores - m)
    denom = jnp.sum(e, axis=-1, keepdims=True)
    a = e * pl.reciprocal(denom, approx=False)                           # (TB, S)

    # Weighted sum over the sequence on the VPU/XLU (sublane reduction).  The
    # f32 `a` promotes enc element-wise, so accumulation is f32 without
    # materializing a full f32 copy of enc, and the MXU slot stays free for
    # the dominant W_v matmul of the next grid step.
    z = jnp.sum(enc * a[:, :, None], axis=1)                             # (TB, 2H)
    out_ref[...] = z.astype(out_ref.dtype)


def _vmem_budget_bytes():
    # ~75% of per-core VMEM: 96 MiB on v5e/v6e (128 MiB), 48 MiB on v7x (64 MiB).
    cap = 64 * 1024 * 1024  # conservative fallback = v7x physical VMEM
    try:
        info = pltpu.get_tpu_info()
        cap = int(getattr(info, "vmem_capacity_bytes", cap))
    except Exception:
        pass
    return max(16 * 1024 * 1024, (cap * 3) // 4)


def _pick_batch_tile(B, S, twoH, H, in_itemsize, budget_bytes):
    """VMEM-budget-aware batch tile. Returns (TB, num_grid_steps)."""
    # bf16 inputs: keep TB a multiple of 16 so packed sublanes don't relayout.
    step = 8 if in_itemsize >= 4 else 16

    def vmem_estimate(tb):
        enc = 2 * tb * S * twoH * in_itemsize          # double-buffered enc block
        hid = 2 * tb * twoH * in_itemsize              # double-buffered hid block
        out = 2 * tb * twoH * 4                        # double-buffered out block
        inter = 2 * tb * S * H * 4                     # o_v and f intermediates (f32)
        weights = 2 * twoH * H * in_itemsize + 2 * H * 4  # Buffered(1) operands
        return enc + hid + out + inter + weights

    if B <= step:
        # Tiny batch: single full-batch block (block == full dim satisfies the
        # (8,128) rule); nothing to pipeline or shard.
        return B, 1

    def ok(tb):
        # Fits the budget and keeps >= 2 grid steps (v7x: both TensorCores busy).
        return vmem_estimate(tb) <= budget_bytes and pl.cdiv(B, tb) >= 2

    # 1) Largest exact-divisor tile (no padded step).
    divisors = [tb for tb in range(step, B, step) if B % tb == 0 and ok(tb)]
    if divisors:
        tb = max(divisors)
        return tb, B // tb

    # 2) Otherwise a fixed tile with a padded last block (pl.cdiv grid keeps
    #    pipelining + megacore sharding; padded batch rows are independent and
    #    their outputs are clipped).
    cands = [tb for tb in range(step, B, step) if ok(tb)]
    tb = max(cands) if cands else step
    # TODO(synk): if even TB==step overflows the budget (very long S), add the
    # S-tiled online-softmax path (second "arbitrary" grid axis over S with
    # running m/l/acc scratch) instead of relying on vmem_limit_bytes alone.
    return tb, pl.cdiv(B, tb)


def text_attention(hidden_state, encoder_outputs, params, *, input_dtype=None):
    """
    hidden_state:    (B, 2H) float32
    encoder_outputs: (B, S, 2H) float32
    params: dict with
      wv: (2H, H), bv: (H,), wh: (2H, H), bh: (H,), wu: (1, H)
      (wv/wh pre-transposed to (in_features, out_features); wu is the PyTorch
       W_u.weight row vector.)
    input_dtype: optionally jnp.bfloat16 (v6e/v7x) to halve HBM traffic for the
      enc/hid/weight streams; softmax / reductions / accumulation stay f32.
    returns z: (B, 2H) float32
    """
    B, S, twoH = encoder_outputs.shape
    H = params["wv"].shape[1]

    # Fold the two Linear biases into one row vector; W_u as a (1, H) f32 row.
    b = (params["bv"] + params["bh"]).reshape(1, H).astype(jnp.float32)
    wu = params["wu"].reshape(1, H).astype(jnp.float32)

    enc = encoder_outputs
    hid = hidden_state
    wv = params["wv"]
    wh = params["wh"]
    if input_dtype is not None:
        enc = enc.astype(input_dtype)
        hid = hid.astype(input_dtype)
        wv = wv.astype(input_dtype)
        wh = wh.astype(input_dtype)

    in_itemsize = jnp.dtype(enc.dtype).itemsize
    budget = _vmem_budget_bytes()
    TB, n_steps = _pick_batch_tile(B, S, twoH, H, in_itemsize, budget)
    grid = (n_steps,)

    # Advisory cost estimate so XLA can schedule around the custom call.
    flops = (2 * B * S * twoH * H          # W_v matmul
             + 2 * B * twoH * H            # W_h matmul
             + 2 * B * S * H               # score multiply+reduce
             + 2 * B * S * twoH)           # weighted sum
    transcendentals = B * S * (H + 1)      # tanh + exp
    bytes_accessed = (enc.size * in_itemsize + hid.size * in_itemsize
                      + wv.size * in_itemsize + wh.size * in_itemsize
                      + wu.size * 4 + b.size * 4 + B * twoH * 4)

    out = pl.pallas_call(
        _text_attention_kernel,
        out_shape=jax.ShapeDtypeStruct((B, twoH), jnp.float32),
        grid_spec=pltpu.PrefetchScalarGridSpec(
            num_scalar_prefetch=0,
            grid=grid,
            in_specs=[
                pl.BlockSpec((TB, S, twoH), lambda i: (i, 0, 0)),   # encoder_outputs
                pl.BlockSpec((TB, twoH), lambda i: (i, 0)),         # hidden_state
                # Grid-invariant operands: single-buffered (no wasted VMEM copy).
                pl.BlockSpec((twoH, H), lambda i: (0, 0),
                             pipeline_mode=pl.Buffered(1)),         # W_v (in,out)
                pl.BlockSpec((twoH, H), lambda i: (0, 0),
                             pipeline_mode=pl.Buffered(1)),         # W_h (in,out)
                pl.BlockSpec((1, H), lambda i: (0, 0),
                             pipeline_mode=pl.Buffered(1)),         # W_u row
                pl.BlockSpec((1, H), lambda i: (0, 0),
                             pipeline_mode=pl.Buffered(1)),         # folded bias
            ],
            out_specs=pl.BlockSpec((TB, twoH), lambda i: (i, 0)),
        ),
        compiler_params=pltpu.CompilerParams(
            dimension_semantics=("parallel",),
            vmem_limit_bytes=int(budget)),
        cost_estimate=pl.CostEstimate(
            flops=int(flops),
            transcendentals=int(transcendentals),
            bytes_accessed=int(bytes_accessed)),
    )(enc, hid, wv, wh, wu, b)

    return out


def _reference(hidden_state, encoder_outputs, params):
    """Pure-JAX reference mirroring the PyTorch module."""
    o_v = encoder_outputs @ params["wv"] + params["bv"]           # (B, S, H)
    o_h = hidden_state @ params["wh"] + params["bh"]              # (B, H)
    f = jnp.tanh(o_v + o_h[:, None, :])                           # (B, S, H)
    o_attn = f @ params["wu"].T                                   # (B, S, 1)
    a = jax.nn.softmax(o_attn, axis=1)
    return jnp.sum(encoder_outputs * a, axis=1)                   # (B, 2H)


if __name__ == "__main__":
    # Small shapes implied by the module: hidden_size H, seq S, batch B.
    B, S, H = 2, 8, 32
    twoH = 2 * H

    key = jax.random.PRNGKey(0)
    k_enc, k_hid, k_wv, k_bv, k_wh, k_bh, k_wu = jax.random.split(key, 7)

    encoder_outputs = jax.random.normal(k_enc, (B, S, twoH), dtype=jnp.float32)
    hidden_state = jax.random.normal(k_hid, (B, twoH), dtype=jnp.float32)

    # Deterministic parameter init (uniform ~ PyTorch default scale), stored
    # pre-transposed as (in_features, out_features); wu as the (1, H) row.
    def uinit(k, shape, fan_in):
        bound = 1.0 / jnp.sqrt(fan_in)
        return jax.random.uniform(k, shape, jnp.float32, -bound, bound)

    params = {
        "wv": uinit(k_wv, (twoH, H), twoH),
        "bv": uinit(k_bv, (H,), twoH),
        "wh": uinit(k_wh, (twoH, H), twoH),
        "bh": uinit(k_bh, (H,), twoH),
        "wu": uinit(k_wu, (1, H), H),
    }

    z = text_attention(hidden_state, encoder_outputs, params)
    z = jax.block_until_ready(z)

    z_ref = _reference(hidden_state, encoder_outputs, params)
    assert z.shape == (B, twoH)
    assert jnp.allclose(z, z_ref, atol=1e-5, rtol=1e-5), (
        f"max abs err {jnp.max(jnp.abs(z - z_ref))}")

    print("KERNEL_OK")
</pallas_src>

<mosaic_0001>
module attributes {stable_mosaic.version = 11 : i64} {
  func.func @_text_attention_kernel(%arg0: i32, %arg1: memref<2x8x64xf32, #tpu.memory_space<vmem>>, %arg2: memref<2x64xf32, #tpu.memory_space<vmem>>, %arg3: memref<64x32xf32, #tpu.memory_space<vmem>>, %arg4: memref<64x32xf32, #tpu.memory_space<vmem>>, %arg5: memref<1x32xf32, #tpu.memory_space<vmem>>, %arg6: memref<1x32xf32, #tpu.memory_space<vmem>>, %arg7: memref<2x64xf32, #tpu.memory_space<vmem>>) attributes {dimension_semantics = [#tpu.dimension_semantics<parallel>], iteration_bounds = array<i64: 1>, scalar_prefetch = 0 : i64, scratch_operands = 0 : i64, tpu.core_type = #tpu.core_type<tc>, window_params = [{transform_indices = @transform_0, window_bounds = array<i64: 2, 8, 64>}, {transform_indices = @transform_1, window_bounds = array<i64: 2, 64>}, {pipeline_mode = #tpu.pipeline_mode<synchronous>, transform_indices = @transform_2, window_bounds = array<i64: 64, 32>}, {pipeline_mode = #tpu.pipeline_mode<synchronous>, transform_indices = @transform_3, window_bounds = array<i64: 64, 32>}, {pipeline_mode = #tpu.pipeline_mode<synchronous>, transform_indices = @transform_4, window_bounds = array<i64: 1, 32>}, {pipeline_mode = #tpu.pipeline_mode<synchronous>, transform_indices = @transform_5, window_bounds = array<i64: 1, 32>}, {transform_indices = @transform_6, window_bounds = array<i64: 2, 64>}]} {
    %c0 = arith.constant 0 : index
    %c0_0 = arith.constant 0 : index
    %c0_1 = arith.constant 0 : index
    %0 = vector.load %arg1[%c0, %c0_0, %c0_1] : memref<2x8x64xf32, #tpu.memory_space<vmem>>, vector<2x8x64xf32>
    %c0_2 = arith.constant 0 : index
    %c0_3 = arith.constant 0 : index
    %1 = vector.load %arg2[%c0_2, %c0_3] : memref<2x64xf32, #tpu.memory_space<vmem>>, vector<2x64xf32>
    %2 = vector.shape_cast %0 : vector<2x8x64xf32> to vector<16x64xf32>
    %c0_4 = arith.constant 0 : index
    %c0_5 = arith.constant 0 : index
    %3 = vector.load %arg3[%c0_4, %c0_5] : memref<64x32xf32, #tpu.memory_space<vmem>>, vector<64x32xf32>
    %cst = arith.constant dense<0.000000e+00> : vector<16x32xf32>
    %4 = tpu.matmul %2, %3, %cst {dimension_numbers = #tpu.dot_dimension_numbers<[1], [0], [0], [1], [0, 0, 1, 1], [], []>} : vector<16x64xf32>, vector<64x32xf32>, vector<16x32xf32> -> vector<16x32xf32>
    %5 = vector.shape_cast %4 : vector<16x32xf32> to vector<2x8x32xf32>
    %c0_6 = arith.constant 0 : index
    %c0_7 = arith.constant 0 : index
    %6 = vector.load %arg4[%c0_6, %c0_7] : memref<64x32xf32, #tpu.memory_space<vmem>>, vector<64x32xf32>
    %cst_8 = arith.constant dense<0.000000e+00> : vector<2x32xf32>
    %7 = tpu.matmul %1, %6, %cst_8 {dimension_numbers = #tpu.dot_dimension_numbers<[1], [0], [0], [1], [0, 0, 1, 1], [], []>} : vector<2x64xf32>, vector<64x32xf32>, vector<2x32xf32> -> vector<2x32xf32>
    %c0_9 = arith.constant 0 : index
    %c0_10 = arith.constant 0 : index
    %8 = vector.load %arg6[%c0_9, %c0_10] : memref<1x32xf32, #tpu.memory_space<vmem>>, vector<1x32xf32>
    %9 = vector.broadcast %8 : vector<1x32xf32> to vector<2x32xf32>
    %10 = arith.addf %7, %9 : vector<2x32xf32>
    %11 = vector.shape_cast %10 : vector<2x32xf32> to vector<2x1x32xf32>
    %12 = vector.broadcast %11 : vector<2x1x32xf32> to vector<2x8x32xf32>
    %13 = arith.addf %5, %12 : vector<2x8x32xf32>
    %14 = math.tanh %13 : vector<2x8x32xf32>
    %c0_11 = arith.constant 0 : index
    %c0_12 = arith.constant 0 : index
    %15 = vector.load %arg5[%c0_11, %c0_12] : memref<1x32xf32, #tpu.memory_space<vmem>>, vector<1x32xf32>
    %16 = vector.shape_cast %15 : vector<1x32xf32> to vector<1x1x32xf32>
    %17 = vector.broadcast %16 : vector<1x1x32xf32> to vector<2x8x32xf32>
    %18 = arith.mulf %14, %17 : vector<2x8x32xf32>
    %cst_13 = arith.constant dense<0.000000e+00> : vector<2x8xf32>
    %19 = vector.multi_reduction <add>, %18, %cst_13 [2] : vector<2x8x32xf32> to vector<2x8xf32>
    %cst_14 = arith.constant dense<0xFF800000> : vector<2xf32>
    %20 = vector.multi_reduction <maximumf>, %19, %cst_14 [1] : vector<2x8xf32> to vector<2xf32>
    %21 = vector.shape_cast %20 : vector<2xf32> to vector<2x1xf32>
    %22 = vector.broadcast %21 : vector<2x1xf32> to vector<2x8xf32>
    %23 = arith.subf %19, %22 : vector<2x8xf32>
    %24 = math.exp %23 : vector<2x8xf32>
    %cst_15 = arith.constant dense<0.000000e+00> : vector<2xf32>
    %25 = vector.multi_reduction <add>, %24, %cst_15 [1] : vector<2x8xf32> to vector<2xf32>
    %26 = vector.shape_cast %25 : vector<2xf32> to vector<2x1xf32>
    %27 = tpu.reciprocal %26 : vector<2x1xf32> -> vector<2x1xf32>
    %28 = vector.broadcast %27 : vector<2x1xf32> to vector<2x8xf32>
    %29 = arith.mulf %24, %28 : vector<2x8xf32>
    %30 = vector.shape_cast %29 : vector<2x8xf32> to vector<2x8x1xf32>
    %31 = vector.broadcast %30 : vector<2x8x1xf32> to vector<2x8x64xf32>
    %32 = arith.mulf %0, %31 : vector<2x8x64xf32>
    %cst_16 = arith.constant dense<0.000000e+00> : vector<2x64xf32>
    %33 = vector.multi_reduction <add>, %32, %cst_16 [1] : vector<2x8x64xf32> to vector<2x64xf32>
    %c0_17 = arith.constant 0 : index
    %c0_18 = arith.constant 0 : index
    %34 = vector.load %arg7[%c0_17, %c0_18] : memref<2x64xf32, #tpu.memory_space<vmem>>, vector<2x64xf32>
    tpu.vector_store %arg7[%c0_17, %c0_18], %33 {strides = array<i32>} : memref<2x64xf32, #tpu.memory_space<vmem>>, vector<2x64xf32>,
    return
  }
  func.func @transform_0(%arg0: i32) -> (i32, i32, i32) {
    %c0_i32 = arith.constant 0 : i32
    %c0_i32_0 = arith.constant 0 : i32
    %c0_i32_1 = arith.constant 0 : i32
    return %arg0, %c0_i32, %c0_i32_0 : i32, i32, i32
  }
  func.func @transform_1(%arg0: i32) -> (i32, i32) {
    %c0_i32 = arith.constant 0 : i32
    %c0_i32_0 = arith.constant 0 : i32
    return %arg0, %c0_i32 : i32, i32
  }
  func.func @transform_2(%arg0: i32) -> (i32, i32) {
    %c0_i32 = arith.constant 0 : i32
    %c0_i32_0 = arith.constant 0 : i32
    %c0_i32_1 = arith.constant 0 : i32
    return %c0_i32, %c0_i32_0 : i32, i32
  }
  func.func @transform_3(%arg0: i32) -> (i32, i32) {
    %c0_i32 = arith.constant 0 : i32
    %c0_i32_0 = arith.constant 0 : i32
    %c0_i32_1 = arith.constant 0 : i32
    return %c0_i32, %c0_i32_0 : i32, i32
  }
  func.func @transform_4(%arg0: i32) -> (i32, i32) {
    %c0_i32 = arith.constant 0 : i32
    %c0_i32_0 = arith.constant 0 : i32
    %c0_i32_1 = arith.constant 0 : i32
    return %c0_i32, %c0_i32_0 : i32, i32
  }
  func.func @transform_5(%arg0: i32) -> (i32, i32) {
    %c0_i32 = arith.constant 0 : i32
    %c0_i32_0 = arith.constant 0 : i32
    %c0_i32_1 = arith.constant 0 : i32
    return %c0_i32, %c0_i32_0 : i32, i32
  }
  func.func @transform_6(%arg0: i32) -> (i32, i32) {
    %c0_i32 = arith.constant 0 : i32
    %c0_i32_0 = arith.constant 0 : i32
    return %arg0, %c0_i32 : i32, i32
  }
}

</mosaic_0001>

<bundles_post_ra>
// kernel: tpu_custom_call.1
= control target key start
LH: loop header
LB: loop body
LE: loop exit
PB: predicated region body
PF: predicated region fallthrough
CT: control target
= control target key end

     0   :  { %s406_s0 = inlined_call_operand.vmem [shape: f32[2,8,64], index: 0, kind: input, shape index: {}]   ;;  %s407_s1 = inlined_call_operand.vmem [shape: f32[2,64], index: 1, kind: input, shape index: {}]   ;;  %s408_s2 = inlined_call_operand.vmem [shape: f32[64,32], index: 2, kind: input, shape index: {}]   ;;  %s409_s3 = inlined_call_operand.vmem [shape: f32[64,32], index: 3, kind: input, shape index: {}]   ;;  %s410_s4 = inlined_call_operand.vmem [shape: f32[1,32], index: 4, kind: input, shape index: {}]   ;;  %s411_s5 = inlined_call_operand.vmem [shape: f32[1,32], index: 5, kind: input, shape index: {}]   ;;  %s412_s6 = inlined_call_operand.hbm [shape: f32[2,64], index: 6, kind: output, shape index: {}]  }
   0x1   :  { %v34_v0 = vld [vmem:[%s408_s2 + $0x38] sm:$0xff]  ;;  %v33_v2 = vld [vmem:[%s408_s2 + $0x30] sm:$0xff]  ;;  %v32_v4 = vld [vmem:[%s408_s2 + $0x28] sm:$0xff] }
   0x2   :  { %v72_v1 = vld [vmem:[%s409_s3 + $0x38] sm:$0xff]  ;;  %234 = vmatpush.msra.mxu2 %v34_v0  ;;  %v71_v3 = vld [vmem:[%s409_s3 + $0x30] sm:$0xff]  ;;  %50 = vmatpush.msra.mxu0 %v34_v0  ;;  %v70_v5 = vld [vmem:[%s409_s3 + $0x28] sm:$0xff] }
   0x3   :  { %88 = vmatpush.msra.mxu1 %v72_v1  ;;  %v31_v6 = vld [vmem:[%s408_s2 + $0x20] sm:$0xff]  ;;  %v30_v8 = vld [vmem:[%s408_s2 + $0x18] sm:$0xff] }
   0x4   :  { %235 = vmatpush.msra.mxu2 %v33_v2  ;;  %51 = vmatpush.msra.mxu0 %v33_v2  ;;  %v69_v7 = vld [vmem:[%s409_s3 + $0x20] sm:$0xff]  ;;  %v68_v9 = vld [vmem:[%s409_s3 + $0x18] sm:$0xff] }
   0x5   :  { %89 = vmatpush.msra.mxu1 %v71_v3 }
   0x6   :  { %236 = vmatpush.msra.mxu2 %v32_v4  ;;  %52 = vmatpush.msra.mxu0 %v32_v4 }
   0x7   :  { %90 = vmatpush.msra.mxu1 %v70_v5 }
   0x8   :  { %237 = vmatpush.msra.mxu2 %v31_v6 }
   0x9   :  { %91 = vmatpush.msra.mxu1 %v69_v7 }
   0xa   :  { %11 = vsyncpa [#allocation3], 0  ;;  %53 = vmatpush.msra.mxu0 %v31_v6  ;;  %v29_v10 = vld [vmem:[%s408_s2 + $0x10] sm:$0xff]  ;;  %238 = vmatpush.msra.mxu2 %v30_v8  ;;  %v28_v12 = vld [vmem:[%s408_s2 + $0x8] sm:$0xff]  ;;  %vm35_vm0 = vcmask 523264   ;;  %vm116_vm1 = vcmask 261120   ;;  %v125_v37 = vlaneseq }
   0xb   :  { %v67_v11 = vld [vmem:[%s409_s3 + $0x10] sm:$0xff]  ;;  %92 = vmatpush.msra.mxu1 %v68_v9  ;;  %v66_v13 = vld [vmem:[%s409_s3 + $0x8] sm:$0xff]  ;;  %v27_v14 = vld [vmem:[%s408_s2] sm:$0xff]  ;;  %vm129_vm2 = vcmask 1041409   ;;  %vm132_vm3 = vcmask 58368   ;;  %v285_v44 = vmov 0  }
   0xc   :  { %54 = vmatpush.msra.mxu0 %v30_v8  ;;  %239 = vmatpush.msra.mxu2 %v29_v10  ;;  %v65_v15 = vld [vmem:[%s409_s3] sm:$0xff]  ;;  %v373_v16 = vld [vmem:[%s406_s0 + $0x8] sm:$0xff]  ;;  %v126_v38 = vand.u32 127, %v125_v37  ;;  %s222_s13 = sshll.u32 %s412_s6, 4  ;;  %vm213_vm8 = vcmask 517120   ;;  %s223_s13 = int_to_ptr.hbm [resolvable:$true] %s222_s13 }
   0xd   :  { %93 = vmatpush.msra.mxu1 %v67_v11  ;;  %v26_v17 = vld [vmem:[%s407_s1] sm:$0x3]  ;;  %245 = vset.pattern.permute.xlu2 %v285_v44 }
   0xe   :  { %55 = vmatpush.msra.mxu0 %v29_v10  ;;  %240 = vmatpush.msra.mxu2 %v28_v12  ;;  %v381_v18 = vld [vmem:[%s406_s0] sm:$0xff] }
   0xf   :  { %94 = vmatpush.msra.mxu1 %v66_v13  ;;  %v247_v19 = vld [vmem:[%s411_s5] ss:$0 sm:$0xff]  ;;  %244 = vset.pattern.permute.xlu1 %v285_v44 }
  0x10   :  { %56 = vmatpush.msra.mxu0 %v28_v12  ;;  %241 = vmatpush.msra.mxu2 %v27_v14  ;;  %v248_v29 = vld [vmem:[%s410_s4] ss:$0 sm:$0xff]  ;;  %s286_s4 = smov [#allocation2]  }
  0x11   :  { %95 = vmatpush.msra.mxu1 %v65_v15  ;;  %232 = vmatmul.msk.f32.vlgmr.msra.gmra.mxu2 %vm35_vm0, %v373_v16  ;;  %s220_s5 = sshll.u32 %s286_s4, 4  ;;  %s221_s5 = int_to_ptr.vmem [resolvable:$true] %s220_s5 }
  0x12   :  { %233 = vmatmul.msk.f32.vlgmr.msra.gmra.mxu1 %vm35_vm0, %v26_v17  ;;  %57 = vmatpush.msra.mxu0 %v27_v14 }
  0x13   :  { %231 = vmatmul.msk.f32.vlgmr.msra.gmra.mxu0 %vm35_vm0, %v381_v18  ;;  %246 = vset.pattern.permute.xlu0 %v285_v44 }
  0x8f   :  { %v97_v20 = vpop.f32.mrf.mxu1 }
  0x90   :  { %v98_v21 = vadd.f32 %v247_v19, %v97_v20  ;;  %v59_v22 = vpop.f32.mrf.mxu0 }
  0x92   :  { %v101_v23 = vrot.slane %v98_v21, 1  ;;  %v102_v24 = vperm.slane %v98_v21, 0 }
  0x94   :  { %v106_v25 = vadd.f32 %v102_v24, %v59_v22  ;;  %v103_v26 = vperm.slane %v101_v23, 0  ;;  %v62_v27 = vpop.f32.mrf.mxu2 }
  0x96   :  { %249 = vtanh.f32 %v106_v25  ;;  %v107_v28 = vadd.f32 %v103_v26, %v62_v27 }
  0x98   :  { %251 = vtanh.f32 %v107_v28 }
  0x9c   :  { %v250_v30 = vpop.eup %249 }
  0x9d   :  { %v114_v31 = vmul.f32 %v250_v30, %v248_v29 }
  0x9e   :  { %v252_v33 = vpop.eup %251 }
  0x9f   :  { %v117_v32 = vsel %vm116_vm1, %v114_v31, 0.0  ;;  %v115_v34 = vmul.f32 %v252_v33, %v248_v29 }
  0xa0   :  { %118 = vadd.xlane.f32.xlu0 %v117_v32 }
  0xa1   :  { %v120_v35 = vsel %vm116_vm1, %v115_v34, 0.0 }
  0xa8   :  { %121 = vadd.xlane.f32.xlu0 %v120_v35 }
 0x113   :  { %v119_v36 = vpop.xlane.xlu0 %118 }
 0x114   :  { %v127_v40 = vperm.slane %v119_v36, %v126_v38 }
 0x11b   :  { %v122_v39 = vpop.xlane.xlu0 %121 }
 0x11c   :  { %v128_v41 = vperm.slane %v122_v39, %v126_v38 }
 0x11e   :  { %v130_v42 = vsel %vm129_vm2, %v128_v41, %v127_v40 }
 0x11f   :  { %v133_v43 = vsel %vm132_vm3, %v130_v42, -inf }
 0x120   :  { %134 = vmax.xlane.f32.xlu1 %v133_v43 }
 0x193   :  { %v135_v45 = vpop.xlane.xlu1 %134 }
 0x194   :  { %v137_v46 = vperm.slane %v135_v45, 0  ;;  %v138_v47 = vperm.slane %v135_v45, 1 }
 0x196   :  { %v141_v48 = vsub.f32 %v119_v36, %v137_v46  ;;  %v142_v49 = vsub.f32 %v122_v39, %v138_v47 }
 0x198   :  { %v143_v50 = vmul.f32 1.442695, %v141_v48  ;;  %v145_v51 = vmul.f32 1.442695, %v142_v49 }
 0x19a   :  { %253 = vpow2.f32 %v143_v50 }
 0x19b   :  { %255 = vpow2.f32 %v145_v51 }
 0x1a0   :  { %v254_v52 = vpop.eup %253 }
 0x1a1   :  { %v256_v53 = vpop.eup %255  ;;  %150 = vperm.xlu1 %244, %v254_v52  }
 0x1a2   :  { %153 = vperm.xlu2 %245, %v256_v53  }
 0x1fc   :  { %v154_v54 = vpop.permute.xlu2 %153 }
 0x1fd   :  { %v156_v56 = vperm.slane %v154_v54, %v126_v38 }
 0x213   :  { %v151_v55 = vpop.permute.xlu1 %150 }
 0x214   :  { %v155_v57 = vperm.slane %v151_v55, %v126_v38 }
 0x216   :  { %v157_v58 = vsel %vm129_vm2, %v156_v56, %v155_v57 }
 0x217   :  { %v159_v59 = vsel %vm132_vm3, %v157_v58, 0.0 }
 0x218   :  { %160 = vadd.xlane.f32.xlu2 %v159_v59 }
 0x28b   :  { %v161_v60 = vpop.xlane.xlu2 %160 }
 0x28c   :  { %257 = vrcp.f32 %v161_v60  ;;  %v173_v0 = vand.u32 2147483648, %v161_v60  ;;  %v171_v2 = vand.u32 2147483647, %v161_v60  ;;  %vm167_vm5 = vweird.f32 %v161_v60 }
 0x28e   :  { %v174_v4 = vor.u32 1.1754944e-38, %v173_v0  ;;  %vm172_vm7 = vcmp.eq.f32.partialorder %v171_v2, 8.507059e+37 }
 0x292   :  { %v258_v61 = vpop.eup %257 }
 0x293   :  { %v163_v62 = vmul.f32 %v258_v61, %v161_v60  ;;  %vm168_vm4 = vweird.f32 %v258_v61 }
 0x294   :  { %vm169_vm6 = vmor %vm167_vm5, %vm168_vm4 }
 0x295   :  { %v164_v63 = vsub.f32 1.0, %v163_v62 }
 0x297   :  { %v165_v1 = vmul.f32 %v258_v61, %v164_v63 }
 0x299   :  { %v166_v3 = vadd.f32 %v258_v61, %v165_v1 }
 0x29b   :  { %v170_v5 = vsel %vm169_vm6, %v258_v61, %v166_v3 }
 0x29c   :  { %v175_v6 = vsel %vm172_vm7, %v174_v4, %v170_v5 }
 0x29d   :  { %v178_v7 = vperm.slane %v175_v6, 1  ;;  %v177_v8 = vperm.slane %v175_v6, 0 }
 0x29f   :  { %v182_v9 = vmul.f32 %v256_v53, %v178_v7  ;;  %v181_v10 = vmul.f32 %v254_v52, %v177_v8 }
 0x2a1   :  { %190 = vperm.xlu1 %244, %v182_v9   ;;  %185 = vperm.xlu0 %246, %v181_v10  }
 0x313   :  { %v191_v11 = vpop.permute.xlu1 %190  ;;  %v186_v12 = vpop.permute.xlu0 %185 }
 0x314   :  { %v194_v13 = vmul.f32 %v191_v11, %v373_v16  ;;  %v193_v14 = vmul.f32 %v186_v12, %v381_v18 }
 0x316   :  { %v202_v15 = vsel %vm35_vm0, %v194_v13, 0.0  ;;  %v195_v17 = vsel %vm35_vm0, %v193_v14, 0.0 }
 0x317   :  { %v203_v19 = vrot.slane %v202_v15, 4  ;;  %v196_v20 = vrot.slane %v195_v17, 4 }
 0x319   :  { %v204_v21 = vadd.f32 %v203_v19, %v202_v15  ;;  %v197_v22 = vadd.f32 %v196_v20, %v195_v17 }
 0x31b   :  { %v205_v23 = vrot.slane %v204_v21, 2  ;;  %v198_v24 = vrot.slane %v197_v22, 2 }
 0x31d   :  { %v206_v25 = vadd.f32 %v205_v23, %v204_v21  ;;  %v199_v26 = vadd.f32 %v198_v24, %v197_v22 }
 0x31f   :  { %v207_v27 = vrot.slane %v206_v25, 1  ;;  %v200_v28 = vrot.slane %v199_v26, 1 }
 0x321   :  { %v208_v16 = vadd.f32 %v207_v27, %v206_v25  ;;  %v201_v18 = vadd.f32 %v200_v28, %v199_v26 }
 0x323   :  { %v211_v29 = vsel %vm129_vm2, %v208_v16, %v201_v18 }
 0x324   :  { %214 = vst.msk [vmem:[#allocation2] sm:$0x3] %vm213_vm8, %v211_v29 }
 0x325   :  { %225 = dma.vmem_to_hbm [thread:$0]  %s221_s5, 32, %s223_s13, [#allocation3]  }
 0x326   :  { %283 = dma.done.wait [#allocation3], 32  }
 0x327   :  { %284 = vsyncadd [#allocation3], 4294967264 }
 0x328   :  { %230 = vsyncpa [#allocation3], 1 }

</bundles_post_ra>
